<compile_context>
chip_gen: v6e
topology: v6e:2x2x1
jax: 0.10.0
libtpu: 0.0.40
codegen_flags: <defaults>
</compile_context>

<pallas_src>
import math

import jax
import jax.numpy as jnp
from jax import lax
from jax.experimental import pallas as pl
from jax.experimental.pallas import tpu as pltpu

_LANES = 128
_SUBLANES = 8


def _round_up(x, m):
    return ((x + m - 1) // m) * m


def _cdiv(a, b):
    return (a + b - 1) // b


def _pallas_mse(a, b, *, max_tile_rows=2048):
    """mean((a - b)^2) over all elements; reduction done in a Pallas kernel."""
    assert a.shape == b.shape, (a.shape, b.shape)
    n_elems = math.prod(a.shape)

    a_flat = a.reshape(-1)
    b_flat = b.reshape(-1)

    bulk = (n_elems // _LANES) * _LANES
    tail = n_elems - bulk

    # Tiny ragged tail (< 128 elements, only when n_elems % 128 != 0) is
    # summed in plain JAX; zero extra HBM traffic worth caring about.
    if tail:
        ta = a_flat[bulk:].astype(jnp.float32)
        tb = b_flat[bulk:].astype(jnp.float32)
        tail_sum = jnp.sum((ta - tb) ** 2)
    else:
        tail_sum = jnp.float32(0.0)

    if bulk == 0:
        return tail_sum / jnp.float32(n_elems)

    # No-op when n_elems is a multiple of 128 (the common case for feature
    # maps); otherwise XLA materializes a prefix copy.
    # TODO(synk): a fully in-kernel masked tail would avoid that rare copy.
    a_bulk = a_flat if tail == 0 else a_flat[:bulk]
    b_bulk = b_flat if tail == 0 else b_flat[:bulk]

    rows = bulk // _LANES
    a2d = a_bulk.reshape(rows, _LANES)
    b2d = b_bulk.reshape(rows, _LANES)

    # Large lane-dense blocks: (tile_rows, 128) f32 = tile_rows * 512 B.
    # 2048 rows -> 1 MiB per input block; 2 inputs x 2 pipeline buffers
    # = 4 MiB of VMEM, well inside v5e/v6e/v7x budgets.
    max_tile_rows = max(_SUBLANES, _round_up(max_tile_rows, _SUBLANES))
    tile_rows = min(max_tile_rows, _round_up(rows, _SUBLANES))

    tiles_total = _cdiv(rows, tile_rows)
    # Leading "parallel" axis of size 2: sharded across TensorCores on v7x,
    # a cheap sequential outer loop on single-core v5e/v6e.  Each part owns
    # its own (8,128) output block -> no shared accumulator across the
    # parallel axis.
    n_parts = 2 if tiles_total >= 2 else 1
    tiles_per_part = _cdiv(tiles_total, n_parts)

    exact_split = (n_parts * tiles_per_part == tiles_total)
    need_mask = (rows % tile_rows != 0) or (not exact_split)
    last_tile = tiles_total - 1

    if exact_split:
        in_map = lambda c, i: (c * tiles_per_part + i, 0)
    else:
        # Phantom grid positions (uneven split) re-read the last valid tile;
        # their contribution is masked to zero inside the kernel.
        in_map = lambda c, i: (jnp.minimum(c * tiles_per_part + i, last_tile), 0)

    def kernel(a_ref, b_ref, o_ref):
        c = pl.program_id(0)
        i = pl.program_id(1)

        @pl.when(i == 0)
        def _():
            o_ref[...] = jnp.zeros_like(o_ref)

        d = a_ref[...].astype(jnp.float32) - b_ref[...].astype(jnp.float32)
        dd = d * d

        if need_mask:
            # Zero rows past the end of the array (ragged last tile, phantom
            # tiles of an uneven core split).
            base = (c * tiles_per_part + i) * tile_rows
            row = base + lax.broadcasted_iota(jnp.int32, dd.shape, 0)
            dd = jnp.where(row < rows, dd, jnp.float32(0.0))

        # Fold the (tile_rows, 128) tile onto the resident (8, 128) output
        # block: same-sublane vreg adds on the VPU, no per-step XLU reduce.
        o_ref[...] += dd.reshape(tile_rows // _SUBLANES, _SUBLANES, _LANES).sum(axis=0)

    bytes_in = bulk * (jnp.dtype(a.dtype).itemsize + jnp.dtype(b.dtype).itemsize)
    cost = pl.CostEstimate(
        flops=3 * bulk,
        transcendentals=0,
        bytes_accessed=bytes_in + n_parts * _SUBLANES * _LANES * 4,
    )

    partials = pl.pallas_call(
        kernel,
        out_shape=jax.ShapeDtypeStruct((n_parts * _SUBLANES, _LANES), jnp.float32),
        grid_spec=pltpu.PrefetchScalarGridSpec(
            num_scalar_prefetch=0,
            grid=(n_parts, tiles_per_part),
            in_specs=[
                pl.BlockSpec((tile_rows, _LANES), in_map),
                pl.BlockSpec((tile_rows, _LANES), in_map),
            ],
            out_specs=pl.BlockSpec((_SUBLANES, _LANES), lambda c, i: (c, 0)),
        ),
        compiler_params=pltpu.CompilerParams(
            dimension_semantics=("parallel", "arbitrary"),
            vmem_limit_bytes=32 * 1024 * 1024,
        ),
        cost_estimate=cost,
    )(a2d, b2d)

    total = jnp.sum(partials) + tail_sum
    return total / jnp.float32(n_elems)


def tf_equivariance_loss_forward(tfx, ftx, *, max_tile_rows=2048):
    """Mirror of TfEquivarianceLoss.forward (consistency_type='mse').

    tfx, ftx: NCHW float arrays. If ftx spatial dims differ from tfx, ftx is
    bilinearly resized to tfx's spatial size (glue in plain JAX), then MSE is
    computed by the Pallas kernel.
    """
    if ftx.shape[-2:] != tfx.shape[-2:]:
        # TODO(synk): the bilinear resize is interpolation glue and is kept in
        # plain JAX (jax.image.resize) rather than the Pallas kernel.
        new_shape = ftx.shape[:-2] + tfx.shape[-2:]
        ftx = jax.image.resize(ftx, new_shape, method="bilinear")
    return _pallas_mse(tfx, ftx, max_tile_rows=max_tile_rows)


if __name__ == "__main__":
    key = jax.random.PRNGKey(0)
    k1, k2, k3, k4 = jax.random.split(key, 4)

    # 1) Base case: batch=2, channels=4, spatial=16x16 (NCHW), n % 128 == 0.
    B, C, H, W = 2, 4, 16, 16
    tfx = jax.random.normal(k1, (B, C, H, W), dtype=jnp.float32)
    ftx = jax.random.normal(k2, (B, C, H, W), dtype=jnp.float32)
    loss = jax.block_until_ready(tf_equivariance_loss_forward(tfx, ftx))
    ref = jnp.mean((tfx - ftx) ** 2)
    assert jnp.allclose(loss, ref, rtol=1e-5, atol=1e-6), (loss, ref)

    # 2) Shape-mismatch branch: ftx is resized to tfx's spatial size first.
    ftx_small = jax.random.normal(k2, (B, C, 8, 8), dtype=jnp.float32)
    loss2 = jax.block_until_ready(tf_equivariance_loss_forward(tfx, ftx_small))
    ref2 = jnp.mean(
        (tfx - jax.image.resize(ftx_small, (B, C, H, W), method="bilinear")) ** 2
    )
    assert jnp.allclose(loss2, ref2, rtol=1e-5, atol=1e-6), (loss2, ref2)

    # 3) Multi-tile / two-part / masked-ragged-tile path (tiny tiles on purpose).
    x3 = jax.random.normal(k3, (2, 4, 16, 18), dtype=jnp.float32)
    y3 = jax.random.normal(k4, (2, 4, 16, 18), dtype=jnp.float32)
    loss3 = jax.block_until_ready(_pallas_mse(x3, y3, max_tile_rows=8))
    ref3 = jnp.mean((x3 - y3) ** 2)
    assert jnp.allclose(loss3, ref3, rtol=1e-5, atol=1e-6), (loss3, ref3)

    # 4) Ragged element count (n % 128 != 0): tail handled in plain JAX.
    x4 = jax.random.normal(k3, (2, 4, 17, 17), dtype=jnp.float32)
    y4 = jax.random.normal(k4, (2, 4, 17, 17), dtype=jnp.float32)
    loss4 = jax.block_until_ready(_pallas_mse(x4, y4))
    ref4 = jnp.mean((x4 - y4) ** 2)
    assert jnp.allclose(loss4, ref4, rtol=1e-5, atol=1e-6), (loss4, ref4)

    print("KERNEL_OK")
</pallas_src>

<mosaic_0001>
module attributes {stable_mosaic.version = 11 : i64} {
  func.func @kernel(%arg0: i32, %arg1: i32, %arg2: memref<16x128xf32, #tpu.memory_space<vmem>>, %arg3: memref<16x128xf32, #tpu.memory_space<vmem>>, %arg4: memref<8x128xf32, #tpu.memory_space<vmem>>) attributes {dimension_semantics = [#tpu.dimension_semantics<parallel>, #tpu.dimension_semantics<arbitrary>], iteration_bounds = array<i64: 1, 1>, scalar_prefetch = 0 : i64, scratch_operands = 0 : i64, tpu.core_type = #tpu.core_type<tc>, window_params = [{transform_indices = @transform_0, window_bounds = array<i64: 16, 128>}, {transform_indices = @transform_1, window_bounds = array<i64: 16, 128>}, {transform_indices = @transform_2, window_bounds = array<i64: 8, 128>}]} {
    %c0_i32 = arith.constant 0 : i32
    %0 = arith.cmpi eq, %arg1, %c0_i32 : i32
    %1 = arith.extui %0 : i1 to i32
    %c0_i32_0 = arith.constant 0 : i32
    %2 = arith.cmpi ne, %1, %c0_i32_0 : i32
    scf.if %2 {
      %cst_8 = arith.constant 0.000000e+00 : f32
      %12 = vector.broadcast %cst_8 : f32 to vector<8x128xf32>
      %c0_9 = arith.constant 0 : index
      %c0_10 = arith.constant 0 : index
      %13 = vector.load %arg4[%c0_9, %c0_10] : memref<8x128xf32, #tpu.memory_space<vmem>>, vector<8x128xf32>
      tpu.vector_store %arg4[%c0_9, %c0_10], %12 {strides = array<i32>} : memref<8x128xf32, #tpu.memory_space<vmem>>, vector<8x128xf32>,
    } else {
    }
    %c0 = arith.constant 0 : index
    %c0_1 = arith.constant 0 : index
    %3 = vector.load %arg2[%c0, %c0_1] : memref<16x128xf32, #tpu.memory_space<vmem>>, vector<16x128xf32>
    %c0_2 = arith.constant 0 : index
    %c0_3 = arith.constant 0 : index
    %4 = vector.load %arg3[%c0_2, %c0_3] : memref<16x128xf32, #tpu.memory_space<vmem>>, vector<16x128xf32>
    %5 = arith.subf %3, %4 : vector<16x128xf32>
    %6 = arith.mulf %5, %5 : vector<16x128xf32>
    %c0_4 = arith.constant 0 : index
    %c0_5 = arith.constant 0 : index
    %7 = vector.load %arg4[%c0_4, %c0_5] : memref<8x128xf32, #tpu.memory_space<vmem>>, vector<8x128xf32>
    %8 = vector.shape_cast %6 : vector<16x128xf32> to vector<2x8x128xf32>
    %cst = arith.constant dense<0.000000e+00> : vector<8x128xf32>
    %9 = vector.multi_reduction <add>, %8, %cst [0] : vector<2x8x128xf32> to vector<8x128xf32>
    %10 = arith.addf %7, %9 : vector<8x128xf32>
    %c0_6 = arith.constant 0 : index
    %c0_7 = arith.constant 0 : index
    %11 = vector.load %arg4[%c0_6, %c0_7] : memref<8x128xf32, #tpu.memory_space<vmem>>, vector<8x128xf32>
    tpu.vector_store %arg4[%c0_6, %c0_7], %10 {strides = array<i32>} : memref<8x128xf32, #tpu.memory_space<vmem>>, vector<8x128xf32>,
    return
  }
  func.func @transform_0(%arg0: i32, %arg1: i32) -> (i32, i32) {
    %c1_i32 = arith.constant 1 : i32
    %0 = arith.muli %arg0, %c1_i32 : i32
    %1 = arith.addi %0, %arg1 : i32
    %c0_i32 = arith.constant 0 : i32
    %c0_i32_0 = arith.constant 0 : i32
    return %1, %c0_i32 : i32, i32
  }
  func.func @transform_1(%arg0: i32, %arg1: i32) -> (i32, i32) {
    %c1_i32 = arith.constant 1 : i32
    %0 = arith.muli %arg0, %c1_i32 : i32
    %1 = arith.addi %0, %arg1 : i32
    %c0_i32 = arith.constant 0 : i32
    %c0_i32_0 = arith.constant 0 : i32
    return %1, %c0_i32 : i32, i32
  }
  func.func @transform_2(%arg0: i32, %arg1: i32) -> (i32, i32) {
    %c0_i32 = arith.constant 0 : i32
    %c0_i32_0 = arith.constant 0 : i32
    return %arg0, %c0_i32 : i32, i32
  }
}

</mosaic_0001>

<bundles_post_ra>
// kernel: tpu_custom_call.1
= control target key start
LH: loop header
LB: loop body
LE: loop exit
PB: predicated region body
PF: predicated region fallthrough
CT: control target
= control target key end

     0   :  { %7 = vsyncpa [#allocation3], 0  ;;  %s186_s0 = inlined_call_operand.hbm [shape: f32[16,128], index: 0, kind: input, shape index: {}]   ;;  %s187_s1 = inlined_call_operand.hbm [shape: f32[16,128], index: 1, kind: input, shape index: {}]   ;;  %s188_s2 = inlined_call_operand.hbm [shape: f32[8,128], index: 2, kind: output, shape index: {}]  }
   0x1   :  { %8 = vsyncpa [#allocation6], 0 }
   0x2   :  { %9 = vsyncpa [#allocation4], 0  ;;  %s157_s9 = smov [#allocation2]  }
   0x3   :  { %s19_s10 = sshll.u32 %s157_s9, 4  ;;  %s20_s10 = int_to_ptr.vmem [resolvable:$true] %s19_s10 }
   0x4   :  { %s99_s11 = scalar_lea.vmem %s20_s10, 256  ;;  %p104_p1 = scmp.lt.s32.totalorder %s20_s10, %s20_s10 }
   0x5   :  { %p100_p0 = scmp.ne.s32.totalorder %s20_s10, %s99_s11  ;;  %p105_p2 = scmp.lt.s32.totalorder %s99_s11, %s99_s11 }
   0x7   :  { %p106_p3 = por %p105_p2, %p104_p1 }
   0x9   :  { %p107_p4 = pnand %p106_p3, %p100_p0 }
   0xb   :  { %110 = shalt.err (!%p107_p4)
}
   0xc   :  { %s158_s12 = smov 128   ;;  %s159_s13 = smov 8  }
   0xd   :  { %25 = dma.hbm_to_vmem [thread:$0]  %s186_s0, 256, %s20_s10, [#allocation3], %s158_s12, %s158_s12, %s159_s13  }
   0xe   :  { %s160_s16 = smov [#allocation5]  }
   0xf   :  { %s35_s17 = sshll.u32 %s160_s16, 4  ;;  %s36_s17 = int_to_ptr.vmem [resolvable:$true] %s35_s17 }
  0x10   :  { %s119_s18 = scalar_lea.vmem %s36_s17, 256  ;;  %p124_p6 = scmp.lt.s32.totalorder %s36_s17, %s36_s17 }
  0x11   :  { %p120_p5 = scmp.ne.s32.totalorder %s36_s17, %s119_s18  ;;  %p125_p7 = scmp.lt.s32.totalorder %s119_s18, %s119_s18 }
  0x13   :  { %p126_p8 = por %p125_p7, %p124_p6 }
  0x15   :  { %p127_p9 = pnand %p126_p8, %p120_p5 }
  0x17   :  { %130 = shalt.err (!%p127_p9)
}
  0x18   :  { %41 = dma.hbm_to_vmem [thread:$0]  %s187_s1, 256, %s36_s17, [#allocation6], %s158_s12, %s158_s12, %s159_s13  }
  0x19   :  { %151 = dma.done.wait [#allocation3], 256  }
  0x1a   :  { %152 = vsyncadd [#allocation3], 4294967040 }
  0x1b   :  { %153 = dma.done.wait [#allocation6], 256  }
  0x1c   :  { %154 = vsyncadd [#allocation6], 4294967040  ;;  %v57_v0 = vld [vmem:[#allocation2] sm:$0xff]  ;;  %v58_v1 = vld [vmem:[#allocation2 + $0x8] sm:$0xff]  ;;  %s161_s0 = smov [#allocation7]  }
  0x1d   :  { %v59_v2 = vld [vmem:[#allocation5] sm:$0xff]  ;;  %v60_v3 = vld [vmem:[#allocation5 + $0x8] sm:$0xff]  ;;  %s75_s21 = sshll.u32 %s161_s0, 4  ;;  %s76_s21 = int_to_ptr.vmem [resolvable:$true] %s75_s21 }
  0x1e   :  { %v61_v4 = vsub.f32 %v57_v0, %v59_v2  ;;  %v62_v5 = vsub.f32 %v58_v1, %v60_v3  ;;  %s131_s22 = scalar_lea.vmem %s76_s21, 128  ;;  %p136_p11 = scmp.lt.s32.totalorder %s76_s21, %s76_s21 }
  0x1f   :  { %p132_p10 = scmp.ne.s32.totalorder %s76_s21, %s131_s22  ;;  %p137_p12 = scmp.lt.s32.totalorder %s131_s22, %s131_s22 }
  0x20   :  { %v63_v6 = vmul.f32 %v61_v4, %v61_v4  ;;  %v64_v7 = vmul.f32 %v62_v5, %v62_v5 }
  0x21   :  { %p138_p13 = por %p137_p12, %p136_p11 }
  0x22   :  { %v66_v8 = vadd.f32 %v64_v7, %v63_v6 }
  0x23   :  { %p139_p0 = pnand %p138_p13, %p132_p10 }
  0x24   :  { %68 = vst [vmem:[#allocation7] sm:$0xff] %v66_v8 }
  0x25   :  { %142 = shalt.err (!%p139_p0)
}
  0x26   :  { %78 = dma.vmem_to_hbm [thread:$0]  %s76_s21, 128, %s188_s2, [#allocation4]  }
  0x27   :  { %155 = dma.done.wait [#allocation4], 128  }
  0x28   :  { %156 = vsyncadd [#allocation4], 4294967168 }
  0x29   :  { %82 = vsyncpa [#allocation3], 1 }
  0x2a   :  { %83 = vsyncpa [#allocation6], 1 }
  0x2b   :  { %84 = vsyncpa [#allocation4], 1 }

</bundles_post_ra>
